<compile_context>
chip_gen: v7x
topology: tpu7x:2x2x1
jax: 0.10.0
libtpu: 0.0.40
codegen_flags: <defaults>
</compile_context>

<pallas_src>
import functools

import jax
import jax.numpy as jnp
from jax import lax
from jax.experimental import pallas as pl
from jax.experimental.pallas import tpu as pltpu

LANES = 128
DEFAULT_TILE_ROWS = 8192          # 8192 x 128 x 4B = 4 MiB per f32 input block
CHUNK_ROWS = 512                  # in-kernel reduction chunk (multiple of 32)
VMEM_LIMIT_BYTES = 32 * 1024 * 1024  # covers v5e's 16 MiB default; fine on v6e/v7x


def _sublane_multiple(dtype):
    """Rows per native sublane tile: 8 for 4-byte, 16 for 2-byte, 32 for 1-byte."""
    itemsize = jnp.dtype(dtype).itemsize
    return max(8, 32 // max(itemsize, 1))


def _round_up(a, b):
    return -(-a // b) * b


def _accumulate(x_ref, t_ref, chunk_rows, row_limit):
    """Chunked bool->int32 reduction over the current tile.

    Returns ((1, LANES), (1, LANES)) int32 per-lane intersection / union
    counts.  row_limit (traced scalar) masks rows >= row_limit (out-of-bounds
    rows of a ragged last tile); None means every row in the tile is valid.
    """
    tile_rows, lanes = x_ref.shape
    n_chunks = tile_rows // chunk_rows

    def body(c, carry):
        inter_acc, union_acc = carry
        r0 = pl.multiple_of(c * chunk_rows, chunk_rows)
        x = x_ref[pl.ds(r0, chunk_rows), :]
        t = t_ref[pl.ds(r0, chunk_rows), :]
        # sigmoid(x) > 0.5  <=>  x > 0   (sigmoid monotone, sigmoid(0) = 0.5)
        pred = x > 0
        targ = t > 0.5
        if row_limit is not None:
            row = r0 + lax.broadcasted_iota(jnp.int32, (chunk_rows, lanes), 0)
            valid = row < row_limit
            pred = pred & valid
            targ = targ & valid
        inter_acc = inter_acc + (pred & targ).astype(jnp.int32).sum(
            axis=0, keepdims=True)
        union_acc = union_acc + (pred | targ).astype(jnp.int32).sum(
            axis=0, keepdims=True)
        return inter_acc, union_acc

    init = (jnp.zeros((1, lanes), jnp.int32), jnp.zeros((1, lanes), jnp.int32))
    if n_chunks == 1:
        return body(0, init)
    return lax.fori_loop(0, n_chunks, body, init)


def _iou_partials_kernel(rows_ref, x_ref, t_ref, out_ref, *, chunk_rows):
    """Per-grid-step partial counts.

    out_ref (block (2, LANES), int32):
      row 0 -> per-lane intersection count for this tile
      row 1 -> per-lane union count for this tile
    """
    step = pl.program_id(0)
    tile_rows = x_ref.shape[0]
    # Valid (unpadded) ROWS remaining starting at this tile.  Row (not
    # element) arithmetic, so no int32 overflow even for huge inputs.
    rows_remaining = rows_ref[0] - step * tile_rows

    def _emit(row_limit):
        inter, union = _accumulate(x_ref, t_ref, chunk_rows, row_limit)
        out_ref[0:1, :] = inter
        out_ref[1:2, :] = union

    @pl.when(rows_remaining >= tile_rows)
    def _():  # full tile: no masking work at all
        _emit(None)

    @pl.when(rows_remaining < tile_rows)
    def _():  # ragged last tile: mask out-of-bounds rows only (row-granularity)
        _emit(rows_remaining)


def iou_loss(inputs, targets, *, tile_rows=DEFAULT_TILE_ROWS):
    """Pallas TPU IOU loss. Accepts arbitrary (matching) shapes and dtypes."""
    assert inputs.shape == targets.shape
    x = inputs.reshape(-1)   # free reshape, native dtype (no f32 cast)
    t = targets.reshape(-1)
    n = x.shape[0]

    rows = -(-n // LANES)
    pad = rows * LANES - n
    if pad:
        # Only when n is not a multiple of 128 (at most 127 elements).
        # Zero padding makes pred (0>0) and targ (0>0.5) both False.
        x = jnp.pad(x, (0, pad))
        t = jnp.pad(t, (0, pad))
    x2 = x.reshape(rows, LANES)
    t2 = t.reshape(rows, LANES)

    # Dtype-aware sublane multiple so sub-32-bit inputs keep native tiling.
    mult = max(_sublane_multiple(x2.dtype), _sublane_multiple(t2.dtype))
    tile_rows = max(mult, (int(tile_rows) // mult) * mult)

    if rows <= tile_rows:
        # Small/medium input: split into (at least) two grid steps so the
        # "parallel" axis shards across both TensorCores on v7x.
        tr = _round_up(max(-(-rows // 2), mult), mult)
    else:
        tr = tile_rows
    if tr > CHUNK_ROWS:
        tr = _round_up(tr, CHUNK_ROWS)   # in-kernel chunk must divide the tile
        chunk = CHUNK_ROWS
    else:
        chunk = tr
    num_steps = -(-rows // tr)

    # Tiny inputs only: pad rows (with zeros) so a block never exceeds the
    # array extent.  Padded rows contribute nothing and are also row-masked.
    if rows < tr:
        x2 = jnp.pad(x2, ((0, tr - rows), (0, 0)))
        t2 = jnp.pad(t2, ((0, tr - rows), (0, 0)))

    rows_arr = jnp.array([rows], dtype=jnp.int32)
    kernel = functools.partial(_iou_partials_kernel, chunk_rows=chunk)

    partials = pl.pallas_call(
        kernel,
        out_shape=jax.ShapeDtypeStruct((num_steps, 2, LANES), jnp.int32),
        grid_spec=pltpu.PrefetchScalarGridSpec(
            num_scalar_prefetch=1,
            grid=(num_steps,),
            in_specs=[
                pl.BlockSpec((tr, LANES), lambda i, rows_ref: (i, 0)),
                pl.BlockSpec((tr, LANES), lambda i, rows_ref: (i, 0)),
            ],
            # Leading dim squeezed: kernel sees a (2, LANES) block per step.
            out_specs=pl.BlockSpec((None, 2, LANES),
                                   lambda i, rows_ref: (i, 0, 0)),
        ),
        compiler_params=pltpu.CompilerParams(
            dimension_semantics=("parallel",),
            vmem_limit_bytes=VMEM_LIMIT_BYTES,
        ),
    )(rows_arr, x2, t2)

    # Exact integer reduction of per-step / per-lane partial counts.
    counts = jnp.sum(partials, axis=(0, 2))          # (2,) int32
    inter = counts[0].astype(jnp.float32)
    union = counts[1].astype(jnp.float32)
    smooth = jnp.float32(1e-05)
    return jnp.float32(1.0) - (inter + smooth) / (union + smooth)


def iou_loss_ref(inputs, targets):
    """Pure-JAX reference mirroring the PyTorch module."""
    smooth = 1e-05
    pred = jax.nn.sigmoid(inputs) > 0.5
    targ = targets > 0.5
    inter = jnp.sum(pred & targ).astype(jnp.float32)
    union = jnp.sum(pred | targ).astype(jnp.float32)
    return 1.0 - (inter + smooth) / (union + smooth)


if __name__ == "__main__":
    key = jax.random.PRNGKey(0)
    k1, k2, k3, k4 = jax.random.split(key, 4)

    # Small segmentation-style NCHW logits/targets.
    x = jax.random.normal(k1, (2, 4, 16, 16), dtype=jnp.float32)
    y = (jax.random.uniform(k2, (2, 4, 16, 16)) > 0.5).astype(jnp.float32)

    loss = iou_loss(x, y)
    jax.block_until_ready(loss)
    ref = iou_loss_ref(x, y)
    assert jnp.allclose(loss, ref, atol=1e-6, rtol=1e-6), (loss, ref)

    # Exercise the multi-step grid path with a tiny tile.
    loss_multi = iou_loss(x, y, tile_rows=8)
    jax.block_until_ready(loss_multi)
    assert jnp.allclose(loss_multi, ref, atol=1e-6, rtol=1e-6), (loss_multi, ref)

    # Exercise the ragged-tail mask path (element count not a multiple of 128,
    # and a last tile with out-of-bounds rows).
    xr = jax.random.normal(k3, (3, 5, 7, 11), dtype=jnp.float32)
    yr = (jax.random.uniform(k4, (3, 5, 7, 11)) > 0.5).astype(jnp.float32)
    loss_r = iou_loss(xr, yr)
    jax.block_until_ready(loss_r)
    ref_r = iou_loss_ref(xr, yr)
    assert jnp.allclose(loss_r, ref_r, atol=1e-6, rtol=1e-6), (loss_r, ref_r)

    print("KERNEL_OK")
</pallas_src>

<mosaic_0001>
module attributes {stable_mosaic.version = 11 : i64} {
  func.func @_iou_partials_kernel(%arg0: i32, %arg1: memref<1xi32, #tpu.memory_space<smem>>, %arg2: memref<8x128xf32, #tpu.memory_space<vmem>>, %arg3: memref<8x128xf32, #tpu.memory_space<vmem>>, %arg4: memref<1x2x128xi32, #tpu.memory_space<vmem>>) attributes {dimension_semantics = [#tpu.dimension_semantics<parallel>], iteration_bounds = array<i64: 2>, scalar_prefetch = 1 : i64, scratch_operands = 0 : i64, tpu.core_type = #tpu.core_type<tc>, window_params = [{transform_indices = @transform_0, window_bounds = array<i64: 8, 128>}, {transform_indices = @transform_1, window_bounds = array<i64: 8, 128>}, {transform_indices = @transform_2, window_bounds = array<i64: 1, 2, 128>}]} {
    %c0 = arith.constant 0 : index
    %0 = memref.load %arg1[%c0] : memref<1xi32, #tpu.memory_space<smem>>
    %c8_i32 = arith.constant 8 : i32
    %1 = arith.muli %arg0, %c8_i32 : i32
    %2 = arith.subi %0, %1 : i32
    %c8_i32_0 = arith.constant 8 : i32
    %3 = arith.cmpi sge, %2, %c8_i32_0 : i32
    %4 = arith.extui %3 : i1 to i32
    %c0_i32 = arith.constant 0 : i32
    %5 = arith.cmpi ne, %4, %c0_i32 : i32
    scf.if %5 {
      %c0_i32_3 = arith.constant 0 : i32
      %9 = vector.broadcast %c0_i32_3 : i32 to vector<1x128xi32>
      %c0_i32_4 = arith.constant 0 : i32
      %10 = vector.broadcast %c0_i32_4 : i32 to vector<1x128xi32>
      %c0_i32_5 = arith.constant 0 : i32
      %11 = tpu.assume_multiple %c0_i32_5, 8 : i32
      %12 = arith.index_cast %11 : i32 to index
      %c0_6 = arith.constant 0 : index
      %13 = vector.load %arg2[%12, %c0_6] : memref<8x128xf32, #tpu.memory_space<vmem>>, vector<8x128xf32>
      %14 = arith.index_cast %11 : i32 to index
      %c0_7 = arith.constant 0 : index
      %15 = vector.load %arg3[%14, %c0_7] : memref<8x128xf32, #tpu.memory_space<vmem>>, vector<8x128xf32>
      %cst = arith.constant 0.000000e+00 : f32
      %16 = vector.broadcast %cst : f32 to vector<8x128xf32>
      %17 = arith.cmpf ogt, %13, %16 : vector<8x128xf32>
      %cst_8 = arith.constant 5.000000e-01 : f32
      %18 = vector.broadcast %cst_8 : f32 to vector<8x128xf32>
      %19 = arith.cmpf ogt, %15, %18 : vector<8x128xf32>
      %20 = arith.andi %17, %19 : vector<8x128xi1>
      %21 = arith.extui %20 : vector<8x128xi1> to vector<8x128xi32>
      %cst_9 = arith.constant dense<0> : vector<128xi32>
      %22 = vector.multi_reduction <add>, %21, %cst_9 [0] : vector<8x128xi32> to vector<128xi32>
      %23 = vector.shape_cast %22 : vector<128xi32> to vector<1x128xi32>
      %24 = arith.addi %9, %23 : vector<1x128xi32>
      %25 = arith.ori %17, %19 : vector<8x128xi1>
      %26 = arith.extui %25 : vector<8x128xi1> to vector<8x128xi32>
      %cst_10 = arith.constant dense<0> : vector<128xi32>
      %27 = vector.multi_reduction <add>, %26, %cst_10 [0] : vector<8x128xi32> to vector<128xi32>
      %28 = vector.shape_cast %27 : vector<128xi32> to vector<1x128xi32>
      %29 = arith.addi %10, %28 : vector<1x128xi32>
      %c0_11 = arith.constant 0 : index
      %c0_12 = arith.constant 0 : index
      %c0_13 = arith.constant 0 : index
      %30 = vector.load %arg4[%c0_11, %c0_12, %c0_13] : memref<1x2x128xi32, #tpu.memory_space<vmem>>, vector<1x1x128xi32>
      %31 = vector.shape_cast %30 : vector<1x1x128xi32> to vector<1x128xi32>
      %32 = vector.shape_cast %24 : vector<1x128xi32> to vector<1x1x128xi32>
      tpu.vector_store %arg4[%c0_11, %c0_12, %c0_13], %32 {strides = array<i32>} : memref<1x2x128xi32, #tpu.memory_space<vmem>>, vector<1x1x128xi32>,
      %c0_14 = arith.constant 0 : index
      %c1 = arith.constant 1 : index
      %c0_15 = arith.constant 0 : index
      %33 = vector.load %arg4[%c0_14, %c1, %c0_15] : memref<1x2x128xi32, #tpu.memory_space<vmem>>, vector<1x1x128xi32>
      %34 = vector.shape_cast %33 : vector<1x1x128xi32> to vector<1x128xi32>
      %35 = vector.shape_cast %29 : vector<1x128xi32> to vector<1x1x128xi32>
      tpu.vector_store %arg4[%c0_14, %c1, %c0_15], %35 {strides = array<i32>} : memref<1x2x128xi32, #tpu.memory_space<vmem>>, vector<1x1x128xi32>,
    } else {
    }
    %c8_i32_1 = arith.constant 8 : i32
    %6 = arith.cmpi slt, %2, %c8_i32_1 : i32
    %7 = arith.extui %6 : i1 to i32
    %c0_i32_2 = arith.constant 0 : i32
    %8 = arith.cmpi ne, %7, %c0_i32_2 : i32
    scf.if %8 {
      %c0_i32_3 = arith.constant 0 : i32
      %9 = vector.broadcast %c0_i32_3 : i32 to vector<1x128xi32>
      %c0_i32_4 = arith.constant 0 : i32
      %10 = vector.broadcast %c0_i32_4 : i32 to vector<1x128xi32>
      %c0_i32_5 = arith.constant 0 : i32
      %11 = tpu.assume_multiple %c0_i32_5, 8 : i32
      %12 = arith.index_cast %11 : i32 to index
      %c0_6 = arith.constant 0 : index
      %13 = vector.load %arg2[%12, %c0_6] : memref<8x128xf32, #tpu.memory_space<vmem>>, vector<8x128xf32>
      %14 = arith.index_cast %11 : i32 to index
      %c0_7 = arith.constant 0 : index
      %15 = vector.load %arg3[%14, %c0_7] : memref<8x128xf32, #tpu.memory_space<vmem>>, vector<8x128xf32>
      %cst = arith.constant 0.000000e+00 : f32
      %16 = vector.broadcast %cst : f32 to vector<8x128xf32>
      %17 = arith.cmpf ogt, %13, %16 : vector<8x128xf32>
      %cst_8 = arith.constant 5.000000e-01 : f32
      %18 = vector.broadcast %cst_8 : f32 to vector<8x128xf32>
      %19 = arith.cmpf ogt, %15, %18 : vector<8x128xf32>
      %20 = tpu.iota {dimensions = array<i32: 0>} : vector<8x128xi32>
      %21 = vector.broadcast %11 : i32 to vector<8x128xi32>
      %22 = arith.addi %21, %20 : vector<8x128xi32>
      %23 = vector.broadcast %2 : i32 to vector<8x128xi32>
      %24 = arith.cmpi slt, %22, %23 : vector<8x128xi32>
      %25 = arith.andi %17, %24 : vector<8x128xi1>
      %26 = arith.andi %19, %24 : vector<8x128xi1>
      %27 = arith.andi %25, %26 : vector<8x128xi1>
      %28 = arith.extui %27 : vector<8x128xi1> to vector<8x128xi32>
      %cst_9 = arith.constant dense<0> : vector<128xi32>
      %29 = vector.multi_reduction <add>, %28, %cst_9 [0] : vector<8x128xi32> to vector<128xi32>
      %30 = vector.shape_cast %29 : vector<128xi32> to vector<1x128xi32>
      %31 = arith.addi %9, %30 : vector<1x128xi32>
      %32 = arith.ori %25, %26 : vector<8x128xi1>
      %33 = arith.extui %32 : vector<8x128xi1> to vector<8x128xi32>
      %cst_10 = arith.constant dense<0> : vector<128xi32>
      %34 = vector.multi_reduction <add>, %33, %cst_10 [0] : vector<8x128xi32> to vector<128xi32>
      %35 = vector.shape_cast %34 : vector<128xi32> to vector<1x128xi32>
      %36 = arith.addi %10, %35 : vector<1x128xi32>
      %c0_11 = arith.constant 0 : index
      %c0_12 = arith.constant 0 : index
      %c0_13 = arith.constant 0 : index
      %37 = vector.load %arg4[%c0_11, %c0_12, %c0_13] : memref<1x2x128xi32, #tpu.memory_space<vmem>>, vector<1x1x128xi32>
      %38 = vector.shape_cast %37 : vector<1x1x128xi32> to vector<1x128xi32>
      %39 = vector.shape_cast %31 : vector<1x128xi32> to vector<1x1x128xi32>
      tpu.vector_store %arg4[%c0_11, %c0_12, %c0_13], %39 {strides = array<i32>} : memref<1x2x128xi32, #tpu.memory_space<vmem>>, vector<1x1x128xi32>,
      %c0_14 = arith.constant 0 : index
      %c1 = arith.constant 1 : index
      %c0_15 = arith.constant 0 : index
      %40 = vector.load %arg4[%c0_14, %c1, %c0_15] : memref<1x2x128xi32, #tpu.memory_space<vmem>>, vector<1x1x128xi32>
      %41 = vector.shape_cast %40 : vector<1x1x128xi32> to vector<1x128xi32>
      %42 = vector.shape_cast %36 : vector<1x128xi32> to vector<1x1x128xi32>
      tpu.vector_store %arg4[%c0_14, %c1, %c0_15], %42 {strides = array<i32>} : memref<1x2x128xi32, #tpu.memory_space<vmem>>, vector<1x1x128xi32>,
    } else {
    }
    return
  }
  func.func @transform_0(%arg0: i32, %arg1: memref<1xi32, #tpu.memory_space<smem>>) -> (i32, i32) {
    %c0_i32 = arith.constant 0 : i32
    %c0_i32_0 = arith.constant 0 : i32
    return %arg0, %c0_i32 : i32, i32
  }
  func.func @transform_1(%arg0: i32, %arg1: memref<1xi32, #tpu.memory_space<smem>>) -> (i32, i32) {
    %c0_i32 = arith.constant 0 : i32
    %c0_i32_0 = arith.constant 0 : i32
    return %arg0, %c0_i32 : i32, i32
  }
  func.func @transform_2(%arg0: i32, %arg1: memref<1xi32, #tpu.memory_space<smem>>) -> (i32, i32, i32) {
    %c0_i32 = arith.constant 0 : i32
    %c0_i32_0 = arith.constant 0 : i32
    %c0_i32_1 = arith.constant 0 : i32
    return %arg0, %c0_i32, %c0_i32_0 : i32, i32, i32
  }
}

</mosaic_0001>

<bundles_post_ra>
// kernel: tpu_custom_call.1
= control target key start
LH: loop header
LB: loop body
LE: loop exit
PB: predicated region body
PF: predicated region fallthrough
CT: control target
= control target key end

     0   :  { %s824_s0 = inlined_call_operand.<no memory space> [shape: s32[1], index: 0, kind: input, shape index: {}]   ;;  %s825_s1 = inlined_call_operand.hbm [shape: f32[16,128], index: 1, kind: input, shape index: {}]   ;;  %s826_s2 = inlined_call_operand.hbm [shape: f32[16,128], index: 2, kind: input, shape index: {}]   ;;  %s827_s3 = inlined_call_operand.hbm [shape: s32[2,2,128], index: 3, kind: output, shape index: {}]  }
   0x1   :  { %8 = sst [smem:[#allocation3]] %s824_s0 }
   0x2   :  { %9 = vsyncpa [#allocation5], 0 }
   0x3   :  { %11 = vsyncpa [#allocation5 + $0x1], 0 }
   0x4   :  { %12 = vsyncpa [#allocation8], 0 }
   0x5   :  { %14 = vsyncpa [#allocation8 + $0x1], 0 }
   0x6   :  { %15 = vsyncpa [#allocation6], 0 }
   0x7   :  { %17 = vsyncpa [#allocation6 + $0x1], 0  ;;  %s599_s14 = smov 0   ;;  %s601_s15 = smov 0  }
   0x8   :  { %s603_s16 = smov 0   ;;  %s605_s17 = smov 0  }
   0x9 LB: > { %s620_s0 = sadd.s32 4294967295, %s569_s17   ;;  %s368_s18 = sadd.s32 4294967294, %s569_s17   ;;  %s569_s17 = sphi %s605_s17, %s846_s17   ;;  %s565_s16 = sphi %s603_s16, %s845_s16   ;;  %s561_s15 = sphi %s601_s15, %s844_s15   ;;  %s557_s14 = sphi %s599_s14, %s843_s14  }
   0xa   : > { %s624_s19 = sadd.s32 1, %s569_s17   ;;  %s30_s20 = sadd.s32 1, %s565_s16 }
   0xb   : > { %s27_s21 = ssub.s32 %s569_s17, %s624_s19  ;;  %p37_p0 = scmp.ne.s32.totalorder %s565_s16, %s561_s15 }
   0xc   : > { %p28_p1 = scmp.eq.s32.totalorder %s27_s21, 0  ;;  %p38_p2 = scmp.eq.s32.totalorder %s569_s17, 0 }
   0xd   : > { %p43_p3 = scmp.ne.s32.totalorder %s561_s15, %s557_s14  ;;  %p44_p4 = scmp.eq.s32.totalorder %s620_s0, 0 }
   0xe   : > { %s636_s22 = scalar_select %p28_p1, %s565_s16, %s30_s20  }
   0xf   : > { %p638_p5 = por %p38_p2, %p37_p0  ;;  %p642_p6 = por %p44_p4, %p43_p3 }
  0x10   : > { %p93_p7 = scmp.eq.s32.totalorder %s620_s0, 1  ;;  %p99_p8 = scmp.eq.s32.totalorder %s368_s18, 1 }
  0x11   : > { %s831_s24 = scalar_select %p642_p6, 1, 0 }
  0x12   : > { %p403_p10 = scmp.lt.s32.totalorder %s569_s17, 2  ;;  %p649_p11 = por %p93_p7, %p37_p0 }
  0x13   : > { %p653_p12 = por %p99_p8, %p43_p3  ;;  %s658_s27 = sand.u32 1, %s565_s16  }
  0x14   : > { %s832_s25 = scalar_select %p649_p11, 1, 0 }
  0x15   : > { %s833_s26 = scalar_select %p653_p12, 1, 0 }
  0x16   : > { %s372_s28 = sshll.u32 %s569_s17, 7  ;;  %s371_s29 = sshll.u32 %s658_s27, 3 }
  0x17   : > { %s667_s5 = scalar_lea.hbm %s825_s1, %s372_s28  ;;  %s123_s6 = scalar_lea.vmem [#allocation4], %s371_s29 }
  0x18   : > { %s130_s7 = sshll.u32 %s123_s6, 4  ;;  %p673_p13 = pnand %p403_p10, %p638_p5  ;;  %s677_s7 = int_to_ptr.vmem [resolvable:$true] %s130_s7 }
  0x19   : > { %s120_s9 = scalar_lea.sflag [#allocation5], %s658_s27  ;;  %s439_s10 = scalar_lea.hbm %s667_s5, 128 }
  0x1a   : > { %p440_p2 = scmp.ne.s32.totalorder %s667_s5, %s439_s10  ;;  %p441_p3 = pneg %p673_p13 }
  0x1b   : > { %s444_s13 = scalar_lea.hbm %s825_s1, 256  ;;  %p445_p5 = scmp.lt.u32.totalorder %s667_s5, %s825_s1 }
  0x1c   : > { %p442_p4 = pnand %p441_p3, %p440_p2  ;;  %p446_p8 = scmp.lt.u32.totalorder %s444_s13, %s439_s10 }
  0x1d   : > { %p448_p9 = scmp.lt.u32.totalorder %s439_s10, %s667_s5 }
  0x1e   : > { %p443_p7 = pneg %p442_p4  ;;  %p447_p10 = por %p446_p8, %p445_p5 }
  0x20   : > { %p449_p0 = por %p448_p9, %p447_p10 }
  0x22   : > { %p450_p1 = pnand %p449_p0, %p443_p7 }
  0x24   : > { %453 = shalt.err (!%p450_p1)
}
  0x25   : > { %s454_s21 = scalar_lea.vmem %s677_s7, 128  ;;  %s571_s23 = smov [#allocation4]  }
  0x26   : > { %p455_p2 = scmp.ne.s32.totalorder %s677_s7, %s454_s21  ;;  %s459_s30 = sshll.u32 %s571_s23, 4  ;;  %s460_s30 = int_to_ptr.vmem [resolvable:$false] %s459_s30 }
  0x27   : > { %s461_s4 = scalar_lea.vmem %s460_s30, 256  ;;  %p462_p11 = scmp.lt.s32.totalorder %s677_s7, %s460_s30 }
  0x28   : > { %p457_p4 = pnand %p455_p2, %p441_p3  ;;  %p463_p5 = scmp.lt.s32.totalorder %s461_s4, %s454_s21 }
  0x2a   : > { %p458_p12 = pneg %p457_p4  ;;  %p464_p8 = por %p463_p5, %p462_p11 }
  0x2c   : > { %p465_p9 = pnand %p464_p8, %p458_p12 }
  0x2e   : > { %468 = shalt.err (!%p465_p9)
}
  0x2f   : > { %395 = dma.hbm_to_vmem [thread:$0]  (!%p673_p13), %s667_s5, 128, %s677_s7, %s120_s9  }
  0x30   : > { %p835_p0 = scmp.lt.s32.totalorder %s569_s17, 3  ;;  %p836_p1 = scmp.ge.s32.totalorder %s569_s17, 1 }
  0x31   : > { %s720_s12 = scalar_lea.hbm %s826_s2, %s372_s28  ;;  %s141_s13 = scalar_lea.vmem [#allocation7], %s371_s29 }
  0x32   : > { %p711_p7 = pnand %p836_p1, %p835_p0  ;;  %s148_s18 = sshll.u32 %s141_s13, 4  ;;  %s149_s18 = int_to_ptr.vmem [resolvable:$true] %s148_s18 }
  0x33   : > { %s138_s5 = scalar_lea.sflag [#allocation8], %s658_s27  ;;  %s469_s7 = scalar_lea.hbm %s720_s12, 128 }
  0x34   : > { %s837_s6 = scalar_select %p711_p7, 1, 0 }
  0x35   : > { %p470_p11 = scmp.ne.s32.totalorder %s720_s12, %s469_s7  ;;  %s474_s28 = scalar_lea.hbm %s826_s2, 256 }
  0x36   : > { %p475_p2 = scmp.lt.u32.totalorder %s720_s12, %s826_s2  ;;  %p476_p4 = scmp.lt.u32.totalorder %s474_s28, %s469_s7 }
  0x37   : > { %p472_p12 = pnand %p470_p11, %p441_p3  ;;  %p478_p8 = scmp.lt.u32.totalorder %s469_s7, %s720_s12 }
  0x38   : > { %p477_p5 = por %p476_p4, %p475_p2 }
  0x39   : > { %p473_p10 = pneg %p472_p12 }
  0x3a   : > { %p479_p9 = por %p478_p8, %p477_p5 }
  0x3c   : > { %p480_p0 = pnand %p479_p9, %p473_p10 }
  0x3e   : > { %483 = shalt.err (!%p480_p0)
}
  0x3f   : > { %s484_s27 = scalar_lea.vmem %s149_s18, 128  ;;  %s572_s29 = smov [#allocation7]  }
  0x40   : > { %p485_p1 = scmp.ne.s32.totalorder %s149_s18, %s484_s27  ;;  %s489_s30 = sshll.u32 %s572_s29, 4  ;;  %s490_s30 = int_to_ptr.vmem [resolvable:$false] %s489_s30 }
  0x41   : > { %s491_s4 = scalar_lea.vmem %s490_s30, 256  ;;  %p492_p6 = scmp.lt.s32.totalorder %s149_s18, %s490_s30 }
  0x42   : > { %p487_p11 = pnand %p485_p1, %p441_p3  ;;  %p493_p7 = scmp.lt.s32.totalorder %s491_s4, %s484_s27 }
  0x44   : > { %p488_p12 = pneg %p487_p11  ;;  %p494_p2 = por %p493_p7, %p492_p6 }
  0x46   : > { %p495_p4 = pnand %p494_p2, %p488_p12 }
  0x48   : > { %498 = shalt.err (!%p495_p4)
}
  0x49   : > { %398 = dma.hbm_to_vmem [thread:$0]  (!%p673_p13), %s720_s12, 128, %s149_s18, %s138_s5  }
  0x4a   : > { %p838_p10 = scmp.ne.s32.totalorder %s837_s6, 0 }
  0x4b   : > { %s747_s10 = sand.u32 (!%p838_p10), 1, %s561_s15   ;;  %p839_p6 = scmp.ne.s32.totalorder (!%p838_p10), %s831_s24, 0 }
  0x4c   : > { %157 = sbr.rel (%p838_p10) target bundleno = 161 (0xa1), region = 28  ;;  %s376_s11 = sshll.u32 (!%p838_p10), %s747_s10, 3 }
  0x4d   : > { %s160_s13 = scalar_lea.sflag (!%p838_p10), [#allocation5], %s747_s10  ;;  %s751_s7 = scalar_lea.vmem (!%p838_p10), [#allocation4], %s376_s11 }
  0x53   : > { %544 = dma.done.wait (%p839_p6), %s160_s13, 128  }
  0x54   : > { %546 = vsyncadd (%p839_p6), %s160_s13, 4294967168  ;;  %s169_s8 = scalar_lea.sflag [#allocation8], %s747_s10  ;;  %s758_s6 = scalar_lea.vmem [#allocation7], %s376_s11 }
  0x55   : > { %548 = dma.done.wait (%p839_p6), %s169_s8, 128  }
  0x56   : > { %550 = vsyncadd (%p839_p6), %s169_s8, 4294967168  ;;  %s378_s12 = sshll.u32 %s747_s10, 1  ;;  %s198_s18 = sld [smem:[#allocation3]] }
  0x57   : > { %s379_s5 = sshll.u32 %s620_s0, 3  ;;  %s768_s20 = scalar_lea.vmem [#allocation9], %s378_s12 }
  0x5c   : > { %s766_s9 = ssub.s32 %s198_s18, %s379_s5 }
  0x5d   : > { %p380_p13 = scmp.lt.s32.totalorder %s766_s9, 8 }
  0x5e   : > { %v205_v0 = vld [vmem:[%s751_s7] sm:$0xff] (!%p380_p13)  ;;  %v206_v1 = vld [vmem:[%s758_s6] sm:$0xff] (!%p380_p13)  ;;  %v573_v2 = vmov (!%p380_p13), 0  }
  0x5f   : > { %204 = sbr.rel (%p380_p13) target bundleno = 112 (0x70), region = 40  ;;  %vm207_vm0 = vcmp.gt.f32.partialorder (!%p380_p13), %v205_v0, 0.0  ;;  %vm208_vm1 = vcmp.gt.f32.partialorder (!%p380_p13), %v206_v1, 0.5 }
  0x60   : > { %vm209_vm2 = vmand (!%p380_p13), %vm207_vm0, %vm208_vm1 }
  0x61   : > { %v210_v3 = vsel (!%p380_p13), %vm209_vm2, 1, %v573_v2  ;;  %vm217_vm3 = vmor (!%p380_p13), %vm207_vm0, %vm208_vm1 }
  0x62   : > { %v211_v4 = vrot.slane (!%p380_p13), %v210_v3, 4  ;;  %v218_v5 = vsel (!%p380_p13), %vm217_vm3, 1, %v573_v2 }
  0x63   : > { %v219_v6 = vrot.slane (!%p380_p13), %v218_v5, 4 }
  0x64   : > { %v212_v7 = vadd.s32 (!%p380_p13), %v211_v4, %v210_v3 }
  0x65   : > { %v220_v8 = vadd.s32 (!%p380_p13), %v219_v6, %v218_v5 }
  0x66   : > { %v213_v9 = vrot.slane %v212_v7, 2 }
  0x67   : > { %v221_v10 = vrot.slane %v220_v8, 2 }
  0x68   : > { %v214_v11 = vadd.s32 %v213_v9, %v212_v7 }
  0x69   : > { %v222_v12 = vadd.s32 %v221_v10, %v220_v8 }
  0x6a   : > { %v215_v13 = vrot.slane %v214_v11, 1 }
  0x6b   : > { %v223_v14 = vrot.slane %v222_v12, 1 }
  0x6c   : > { %v216_v15 = vadd.s32 %v215_v13, %v214_v11 }
  0x6d   : > { %v224_v16 = vadd.s32 %v223_v14, %v222_v12 }
  0x6e   : > { %225 = vst [vmem:[%s768_s20] sm:$0x1] %v216_v15 }
  0x6f   : > { %226 = vst [vmem:[%s768_s20 + $0x1] sm:$0x1] %v224_v16 }
  0x70 PF: > { %p381_p3 = scmp.ge.s32.totalorder %s766_s9, 8 }
  0x71   : > { %v231_v17 = vld [vmem:[%s751_s7] sm:$0xff] (!%p381_p3)  ;;  %v232_v18 = vld [vmem:[%s758_s6] sm:$0xff] (!%p381_p3)  ;;  %v235_v19 = vlaneseq (!%p381_p3)  ;;  %v239_v20 = vstv (!%p381_p3), %s766_s9  ;;  %v574_v22 = vmov (!%p381_p3), 0  }
  0x72   : > { %230 = sbr.rel (%p381_p3) target bundleno = 136 (0x88), region = 44  ;;  %vm233_vm4 = vcmp.gt.f32.partialorder (!%p381_p3), %v231_v17, 0.0  ;;  %vm234_vm5 = vcmp.gt.f32.partialorder (!%p381_p3), %v232_v18, 0.5 }
  0x73   : > { %v236_v21 = vshrl.u32 (!%p381_p3), %v235_v19, 7 }
  0x75   : > { %vm240_vm6 = vcmp.lt.s32.totalorder (!%p381_p3), %v236_v21, %v239_v20 }
  0x76   : > { %vm241_vm7 = vmand (!%p381_p3), %vm233_vm4, %vm240_vm6 }
  0x77   : > { %vm242_vm8 = vmand (!%p381_p3), %vm234_vm5, %vm240_vm6 }
  0x78   : > { %vm243_vm9 = vmand (!%p381_p3), %vm241_vm7, %vm242_vm8 }
  0x79   : > { %v244_v23 = vsel %vm243_vm9, 1, %v574_v22  ;;  %vm251_vm10 = vmor %vm241_vm7, %vm242_vm8 }
  0x7a   : > { %v245_v24 = vrot.slane %v244_v23, 4  ;;  %v252_v25 = vsel %vm251_vm10, 1, %v574_v22 }
  0x7b   : > { %v253_v26 = vrot.slane %v252_v25, 4 }
  0x7c   : > { %v246_v27 = vadd.s32 %v245_v24, %v244_v23 }
  0x7d   : > { %v254_v28 = vadd.s32 %v253_v26, %v252_v25 }
  0x7e   : > { %v247_v29 = vrot.slane %v246_v27, 2 }
  0x7f   : > { %v255_v30 = vrot.slane %v254_v28, 2 }
  0x80   : > { %v248_v31 = vadd.s32 %v247_v29, %v246_v27 }
  0x81   : > { %v256_v32 = vadd.s32 %v255_v30, %v254_v28 }
  0x82   : > { %v249_v33 = vrot.slane %v248_v31, 1 }
  0x83   : > { %v257_v34 = vrot.slane %v256_v32, 1 }
  0x84   : > { %v250_v35 = vadd.s32 %v249_v33, %v248_v31 }
  0x85   : > { %v258_v36 = vadd.s32 %v257_v34, %v256_v32 }
  0x86   : > { %259 = vst [vmem:[%s768_s20] sm:$0x1] %v250_v35 }
  0x87   : > { %260 = vst [vmem:[%s768_s20 + $0x1] sm:$0x1] %v258_v36 }
  0x88 PF: > { %s383_s24 = sshll.u32 %s620_s0, 5  ;;  %s275_s27 = sshll.u32 %s768_s20, 4  ;;  %s276_s27 = int_to_ptr.vmem [resolvable:$true] %s275_s27 }
  0x89   : > { %s785_s23 = scalar_lea.hbm %s827_s3, %s383_s24  ;;  %s262_s29 = scalar_lea.sflag [#allocation6], %s747_s10 }
  0x8a   : > { %s499_s30 = scalar_lea.vmem %s276_s27, 32  ;;  %p840_p5 = scmp.ne.s32.totalorder %s832_s25, 0 }
  0x8b   : > { %p500_p7 = scmp.ne.s32.totalorder %s276_s27, %s499_s30  ;;  %s575_s4 = smov [#allocation9]  }
  0x8c   : > { %s503_s11 = sshll.u32 %s575_s4, 4  ;;  %s504_s11 = int_to_ptr.vmem [resolvable:$false] %s503_s11 }
  0x8d   : > { %p501_p8 = pnand %p500_p7, %p840_p5  ;;  %s505_s13 = scalar_lea.vmem %s504_s11, 64 }
  0x8e   : > { %p506_p0 = scmp.lt.s32.totalorder %s276_s27, %s504_s11  ;;  %p507_p1 = scmp.lt.s32.totalorder %s505_s13, %s499_s30 }
  0x8f   : > { %p502_p9 = pneg %p501_p8 }
  0x90   : > { %p508_p11 = por %p507_p1, %p506_p0 }
  0x92   : > { %p509_p12 = pnand %p508_p11, %p502_p9 }
  0x94   : > { %512 = shalt.err (!%p509_p12)
}
  0x95   : > { %s513_s0 = scalar_lea.hbm %s785_s23, 32  ;;  %s517_s8 = scalar_lea.hbm %s827_s3, 64 }
  0x96   : > { %p514_p2 = scmp.ne.s32.totalorder %s785_s23, %s513_s0  ;;  %p518_p6 = scmp.lt.u32.totalorder %s785_s23, %s827_s3 }
  0x97   : > { %p519_p13 = scmp.lt.u32.totalorder %s517_s8, %s513_s0  ;;  %p521_p7 = scmp.lt.u32.totalorder %s513_s0, %s785_s23 }
  0x98   : > { %p515_p4 = pnand %p514_p2, %p840_p5 }
  0x99   : > { %p520_p3 = por %p519_p13, %p518_p6 }
  0x9a   : > { %p516_p10 = pneg %p515_p4 }
  0x9b   : > { %p522_p8 = por %p521_p7, %p520_p3 }
  0x9d   : > { %p523_p9 = pnand %p522_p8, %p516_p10 }
  0x9f   : > { %526 = shalt.err (!%p523_p9)
}
  0xa0   : > { %390 = dma.vmem_to_hbm [thread:$0]  (%p840_p5), %s276_s27, 32, %s785_s23, %s262_s29  }
  0xa1 PF: > { %s287_s18 = sand.u32 1, %s557_s14   ;;  %p841_p0 = scmp.ne.s32.totalorder %s833_s26, 0 }
  0xa2   : > { %p842_p1 = scmp.ge.s32.totalorder %s569_s17, 2  ;;  %s288_s5 = scalar_lea.sflag [#allocation6], %s287_s18 }
  0xa4   : > { %p400_p11 = pnand %p842_p1, %p841_p0 }
  0xa6   : > { %552 = dma.done.wait (!%p400_p11), %s288_s5, 32  }
  0xa7   : > { %554 = vsyncadd (!%p400_p11), %s288_s5, 4294967264  ;;  %p20_p12 = scmp.ge.s32.totalorder %s624_s19, 4   ;;  %s843_s14 = smov %s561_s15 }
  0xa8   : > { %s844_s15 = smov %s565_s16  ;;  %s845_s16 = smov %s636_s22 }
  0xa9   : > { %s846_s17 = smov %s624_s19  ;;  %22 = sbr.rel (!%p20_p12) target bundleno = 9 (0x9), region = 94 }
  0xb0   :  { %293 = vsyncpa [#allocation5], 1 }
  0xb1   :  { %295 = vsyncpa [#allocation5 + $0x1], 1 }
  0xb2   :  { %296 = vsyncpa [#allocation8], 1 }
  0xb3   :  { %298 = vsyncpa [#allocation8 + $0x1], 1 }
  0xb4   :  { %299 = vsyncpa [#allocation6], 1 }
  0xb5   :  { %301 = vsyncpa [#allocation6 + $0x1], 1 }

</bundles_post_ra>
